<compile_context>
chip_gen: v5e
topology: v5e:2x2
jax: 0.10.0
libtpu: 0.0.40
codegen_flags: <defaults>
</compile_context>

<pallas_src>
import math

import jax
import jax.numpy as jnp
from jax.experimental import pallas as pl
from jax.experimental.pallas import tpu as pltpu

EMBED = 32
HEADS = 4
HEAD_DIM = EMBED // HEADS
MLP_HIDDEN = int(EMBED * 4.0)
EPS = 1e-5
_INV_SQRT2 = 1.0 / math.sqrt(2.0)
_VEC_ROWS = 8
_VEC_COLS = 128  # >= max(3*EMBED, MLP_HIDDEN); one (8,128) f32 vreg


def _layernorm(x, w, b):
    mean = jnp.mean(x, axis=-1, keepdims=True)
    var = jnp.mean((x - mean) ** 2, axis=-1, keepdims=True)
    return (x - mean) * jax.lax.rsqrt(var + EPS) * w + b


def encoder_layer_kernel(x_ref, wqkv_ref, wo_ref, w1_ref, w2_ref, vec_ref, y_ref):
    _, S, E = x_ref.shape
    H, Dh = HEADS, HEAD_DIM

    # Static views into the packed (8, 128) parameter slab.
    ln1_w = vec_ref[0:1, :E]
    ln1_b = vec_ref[1:2, :E]
    ln2_w = vec_ref[2:3, :E]
    ln2_b = vec_ref[3:4, :E]
    bo = vec_ref[4:5, :E]
    b2 = vec_ref[5:6, :E]
    bqkv = vec_ref[6:7, :3 * E]
    b1 = vec_ref[7:8, :MLP_HIDDEN]

    x = x_ref[0]                                            # (S, E)

    # ---- pre-norm 1 + multi-head self-attention ----
    h = _layernorm(x, ln1_w, ln1_b)                         # (S, E)

    # Single fused QKV projection; 1/sqrt(Dh) already folded into the Q block.
    qkv = jnp.dot(h, wqkv_ref[...],
                  preferred_element_type=jnp.float32) + bqkv  # (S, 3E)
    q = qkv[:, :E].reshape(S, H, Dh)
    k = qkv[:, E:2 * E].reshape(S, H, Dh)
    v = qkv[:, 2 * E:].reshape(S, H, Dh)

    s = jnp.einsum("qhd,khd->hqk", q, k,
                   preferred_element_type=jnp.float32)      # (H, S, S)
    s = s - jnp.max(s, axis=-1, keepdims=True)
    p = jnp.exp(s)
    p = p / jnp.sum(p, axis=-1, keepdims=True)              # exact divide (f32 parity)
    o = jnp.einsum("hqk,khd->qhd", p, v,
                   preferred_element_type=jnp.float32)      # (S, H, Dh)

    # Merge heads once, then a single output projection.
    attn = jnp.dot(o.reshape(S, E), wo_ref[...],
                   preferred_element_type=jnp.float32) + bo
    x = x + attn  # residual 1 (dropout = identity at inference)

    # ---- pre-norm 2 + MLP (Linear -> exact GELU -> Linear) ----
    h2 = _layernorm(x, ln2_w, ln2_b)
    m = jnp.dot(h2, w1_ref[...], preferred_element_type=jnp.float32) + b1
    m = 0.5 * m * (1.0 + jax.lax.erf(m * _INV_SQRT2))       # exact GELU
    m = jnp.dot(m, w2_ref[...], preferred_element_type=jnp.float32) + b2

    y_ref[0] = x + m  # residual 2


def prepare_params(params):
    """One-time host-side repack: PyTorch layout -> kernel-ready operands.

    Call once at init; the per-call path passes these arrays straight through.
    """
    E, Dh = EMBED, HEAD_DIM
    scale = 1.0 / math.sqrt(Dh)

    in_w = params["in_proj_w"]            # (3E, E), rows [Q; K; V]
    in_b = params["in_proj_b"]            # (3E,)
    wq, wk, wv = in_w[:E], in_w[E:2 * E], in_w[2 * E:]
    bq, bk, bv = in_b[:E], in_b[E:2 * E], in_b[2 * E:]

    # Fused (E, 3E) QKV weight with the attention scale folded into Q.
    w_qkv = jnp.concatenate([wq.T * scale, wk.T, wv.T], axis=1)
    b_qkv = jnp.concatenate([bq * scale, bk, bv])

    w_out = params["out_proj_w"].T        # (E, E), contraction-ready
    w1 = params["mlp_w1"].T               # (E, MLP_HIDDEN)
    w2 = params["mlp_w2"].T               # (MLP_HIDDEN, E)

    vec = jnp.zeros((_VEC_ROWS, _VEC_COLS), jnp.float32)
    vec = vec.at[0, :E].set(params["ln1_w"])
    vec = vec.at[1, :E].set(params["ln1_b"])
    vec = vec.at[2, :E].set(params["ln2_w"])
    vec = vec.at[3, :E].set(params["ln2_b"])
    vec = vec.at[4, :E].set(params["out_proj_b"])
    vec = vec.at[5, :E].set(params["mlp_b2"])
    vec = vec.at[6, :3 * E].set(b_qkv)
    vec = vec.at[7, :MLP_HIDDEN].set(params["mlp_b1"])

    return (w_qkv, w_out, w1, w2, vec)


def transformer_encoder_layer(x, kernel_params):
    B, S, E = x.shape
    assert E == EMBED
    w_qkv, w_out, w1, w2, vec = kernel_params

    in_specs = [
        pl.BlockSpec((1, S, E), lambda b: (b, 0, 0)),                 # x
        pl.BlockSpec((E, 3 * E), lambda b: (0, 0)),                   # W_qkv
        pl.BlockSpec((E, E), lambda b: (0, 0)),                       # W_out
        pl.BlockSpec((E, MLP_HIDDEN), lambda b: (0, 0)),              # W1
        pl.BlockSpec((MLP_HIDDEN, E), lambda b: (0, 0)),              # W2
        pl.BlockSpec((_VEC_ROWS, _VEC_COLS), lambda b: (0, 0)),       # packed vectors
    ]
    out_specs = pl.BlockSpec((1, S, E), lambda b: (b, 0, 0))

    return pl.pallas_call(
        encoder_layer_kernel,
        out_shape=jax.ShapeDtypeStruct((B, S, E), jnp.float32),
        grid=(B,),
        in_specs=in_specs,
        out_specs=out_specs,
        compiler_params=pltpu.CompilerParams(
            dimension_semantics=("parallel",)),  # v7x: shard batch over 2 TCs
    )(x, w_qkv, w_out, w1, w2, vec)


def init_params(key):
    ks = jax.random.split(key, 8)
    std = 0.02
    return {
        "ln1_w": jnp.ones((EMBED,), jnp.float32),
        "ln1_b": jnp.zeros((EMBED,), jnp.float32),
        "in_proj_w": std * jax.random.normal(ks[0], (3 * EMBED, EMBED), jnp.float32),
        "in_proj_b": std * jax.random.normal(ks[1], (3 * EMBED,), jnp.float32),
        "out_proj_w": std * jax.random.normal(ks[2], (EMBED, EMBED), jnp.float32),
        "out_proj_b": std * jax.random.normal(ks[3], (EMBED,), jnp.float32),
        "ln2_w": jnp.ones((EMBED,), jnp.float32),
        "ln2_b": jnp.zeros((EMBED,), jnp.float32),
        "mlp_w1": std * jax.random.normal(ks[4], (MLP_HIDDEN, EMBED), jnp.float32),
        "mlp_b1": std * jax.random.normal(ks[5], (MLP_HIDDEN,), jnp.float32),
        "mlp_w2": std * jax.random.normal(ks[6], (EMBED, MLP_HIDDEN), jnp.float32),
        "mlp_b2": std * jax.random.normal(ks[7], (EMBED,), jnp.float32),
    }


if __name__ == "__main__":
    key = jax.random.PRNGKey(0)
    k_x, k_p = jax.random.split(key)
    B, S = 2, 8
    x = jax.random.normal(k_x, (B, S, EMBED), jnp.float32)
    params = init_params(k_p)

    # Host-side repack happens once, outside the per-call path.
    kernel_params = prepare_params(params)

    y = transformer_encoder_layer(x, kernel_params)
    jax.block_until_ready(y)
    assert y.shape == (B, S, EMBED)
    print("KERNEL_OK")
</pallas_src>

<mosaic_0001>
module attributes {stable_mosaic.version = 11 : i64} {
  func.func @encoder_layer_kernel(%arg0: i32, %arg1: memref<1x8x32xf32, #tpu.memory_space<vmem>>, %arg2: memref<32x96xf32, #tpu.memory_space<vmem>>, %arg3: memref<32x32xf32, #tpu.memory_space<vmem>>, %arg4: memref<32x128xf32, #tpu.memory_space<vmem>>, %arg5: memref<128x32xf32, #tpu.memory_space<vmem>>, %arg6: memref<8x128xf32, #tpu.memory_space<vmem>>, %arg7: memref<1x8x32xf32, #tpu.memory_space<vmem>>) attributes {dimension_semantics = [#tpu.dimension_semantics<parallel>], iteration_bounds = array<i64: 2>, scalar_prefetch = 0 : i64, scratch_operands = 0 : i64, tpu.core_type = #tpu.core_type<tc>, window_params = [{transform_indices = @transform_0, window_bounds = array<i64: 1, 8, 32>}, {pipeline_mode = #tpu.pipeline_mode<synchronous>, transform_indices = @transform_1, window_bounds = array<i64: 32, 96>}, {pipeline_mode = #tpu.pipeline_mode<synchronous>, transform_indices = @transform_2, window_bounds = array<i64: 32, 32>}, {pipeline_mode = #tpu.pipeline_mode<synchronous>, transform_indices = @transform_3, window_bounds = array<i64: 32, 128>}, {pipeline_mode = #tpu.pipeline_mode<synchronous>, transform_indices = @transform_4, window_bounds = array<i64: 128, 32>}, {pipeline_mode = #tpu.pipeline_mode<synchronous>, transform_indices = @transform_5, window_bounds = array<i64: 8, 128>}, {transform_indices = @transform_6, window_bounds = array<i64: 1, 8, 32>}]} {
    %c0 = arith.constant 0 : index
    %c0_0 = arith.constant 0 : index
    %0 = vector.load %arg6[%c0, %c0_0] : memref<8x128xf32, #tpu.memory_space<vmem>>, vector<1x32xf32>
    %c1 = arith.constant 1 : index
    %c0_1 = arith.constant 0 : index
    %1 = vector.load %arg6[%c1, %c0_1] : memref<8x128xf32, #tpu.memory_space<vmem>>, vector<1x32xf32>
    %c2 = arith.constant 2 : index
    %c0_2 = arith.constant 0 : index
    %2 = vector.load %arg6[%c2, %c0_2] : memref<8x128xf32, #tpu.memory_space<vmem>>, vector<1x32xf32>
    %c3 = arith.constant 3 : index
    %c0_3 = arith.constant 0 : index
    %3 = vector.load %arg6[%c3, %c0_3] : memref<8x128xf32, #tpu.memory_space<vmem>>, vector<1x32xf32>
    %c4 = arith.constant 4 : index
    %c0_4 = arith.constant 0 : index
    %4 = vector.load %arg6[%c4, %c0_4] : memref<8x128xf32, #tpu.memory_space<vmem>>, vector<1x32xf32>
    %c5 = arith.constant 5 : index
    %c0_5 = arith.constant 0 : index
    %5 = vector.load %arg6[%c5, %c0_5] : memref<8x128xf32, #tpu.memory_space<vmem>>, vector<1x32xf32>
    %c6 = arith.constant 6 : index
    %c0_6 = arith.constant 0 : index
    %6 = vector.load %arg6[%c6, %c0_6] : memref<8x128xf32, #tpu.memory_space<vmem>>, vector<1x96xf32>
    %c7 = arith.constant 7 : index
    %c0_7 = arith.constant 0 : index
    %7 = vector.load %arg6[%c7, %c0_7] : memref<8x128xf32, #tpu.memory_space<vmem>>, vector<1x128xf32>
    %c0_8 = arith.constant 0 : index
    %c0_9 = arith.constant 0 : index
    %c0_10 = arith.constant 0 : index
    %8 = vector.load %arg1[%c0_8, %c0_9, %c0_10] : memref<1x8x32xf32, #tpu.memory_space<vmem>>, vector<1x8x32xf32>
    %9 = vector.shape_cast %8 : vector<1x8x32xf32> to vector<8x32xf32>
    %cst = arith.constant dense<0.000000e+00> : vector<8xf32>
    %10 = vector.multi_reduction <add>, %9, %cst [1] : vector<8x32xf32> to vector<8xf32>
    %11 = vector.shape_cast %10 : vector<8xf32> to vector<8x1xf32>
    %cst_11 = arith.constant 3.200000e+01 : f32
    %12 = vector.broadcast %cst_11 : f32 to vector<8x1xf32>
    %13 = arith.divf %11, %12 : vector<8x1xf32>
    %14 = vector.broadcast %13 : vector<8x1xf32> to vector<8x32xf32>
    %15 = arith.subf %9, %14 : vector<8x32xf32>
    %16 = arith.mulf %15, %15 : vector<8x32xf32>
    %cst_12 = arith.constant dense<0.000000e+00> : vector<8xf32>
    %17 = vector.multi_reduction <add>, %16, %cst_12 [1] : vector<8x32xf32> to vector<8xf32>
    %18 = vector.shape_cast %17 : vector<8xf32> to vector<8x1xf32>
    %cst_13 = arith.constant 3.200000e+01 : f32
    %19 = vector.broadcast %cst_13 : f32 to vector<8x1xf32>
    %20 = arith.divf %18, %19 : vector<8x1xf32>
    %21 = vector.broadcast %13 : vector<8x1xf32> to vector<8x32xf32>
    %22 = arith.subf %9, %21 : vector<8x32xf32>
    %cst_14 = arith.constant 9.99999974E-6 : f32
    %23 = vector.broadcast %cst_14 : f32 to vector<8x1xf32>
    %24 = arith.addf %20, %23 : vector<8x1xf32>
    %25 = math.rsqrt %24 : vector<8x1xf32>
    %26 = vector.broadcast %25 : vector<8x1xf32> to vector<8x32xf32>
    %27 = arith.mulf %22, %26 : vector<8x32xf32>
    %28 = vector.broadcast %0 : vector<1x32xf32> to vector<8x32xf32>
    %29 = arith.mulf %27, %28 : vector<8x32xf32>
    %30 = vector.broadcast %1 : vector<1x32xf32> to vector<8x32xf32>
    %31 = arith.addf %29, %30 : vector<8x32xf32>
    %c0_15 = arith.constant 0 : index
    %c0_16 = arith.constant 0 : index
    %32 = vector.load %arg2[%c0_15, %c0_16] : memref<32x96xf32, #tpu.memory_space<vmem>>, vector<32x96xf32>
    %cst_17 = arith.constant dense<0.000000e+00> : vector<8x96xf32>
    %33 = tpu.matmul %31, %32, %cst_17 {dimension_numbers = #tpu.dot_dimension_numbers<[1], [0], [0], [1], [0, 0, 1, 1], [], []>} : vector<8x32xf32>, vector<32x96xf32>, vector<8x96xf32> -> vector<8x96xf32>
    %34 = vector.broadcast %6 : vector<1x96xf32> to vector<8x96xf32>
    %35 = arith.addf %33, %34 : vector<8x96xf32>
    %36 = vector.extract_strided_slice %35 {offsets = [0, 0], sizes = [8, 32], strides = [1, 1]} : vector<8x96xf32> to vector<8x32xf32>
    %37 = vector.shape_cast %36 : vector<8x32xf32> to vector<8x4x8xf32>
    %38 = vector.extract_strided_slice %35 {offsets = [0, 32], sizes = [8, 32], strides = [1, 1]} : vector<8x96xf32> to vector<8x32xf32>
    %39 = vector.shape_cast %38 : vector<8x32xf32> to vector<8x4x8xf32>
    %40 = vector.extract_strided_slice %35 {offsets = [0, 64], sizes = [8, 32], strides = [1, 1]} : vector<8x96xf32> to vector<8x32xf32>
    %41 = vector.shape_cast %40 : vector<8x32xf32> to vector<8x4x8xf32>
    "tpu.trace_start"() <{level = 10 : i32, message = "qhd,khd->hqk"}> : () -> ()
    %cst_18 = arith.constant dense<0.000000e+00> : vector<4x8x8xf32>
    %42 = tpu.matmul %37, %39, %cst_18 {dimension_numbers = #tpu.dot_dimension_numbers<[2], [2], [0], [0], [0, 1, 0, 0, 1, 0], [1], [1]>} : vector<8x4x8xf32>, vector<8x4x8xf32>, vector<4x8x8xf32> -> vector<4x8x8xf32>
    "tpu.trace_stop"() : () -> ()
    %cst_19 = arith.constant dense<0xFF800000> : vector<4x8xf32>
    %43 = vector.multi_reduction <maximumf>, %42, %cst_19 [2] : vector<4x8x8xf32> to vector<4x8xf32>
    %44 = vector.shape_cast %43 : vector<4x8xf32> to vector<4x8x1xf32>
    %45 = vector.broadcast %44 : vector<4x8x1xf32> to vector<4x8x8xf32>
    %46 = arith.subf %42, %45 : vector<4x8x8xf32>
    %47 = math.exp %46 : vector<4x8x8xf32>
    %cst_20 = arith.constant dense<0.000000e+00> : vector<4x8xf32>
    %48 = vector.multi_reduction <add>, %47, %cst_20 [2] : vector<4x8x8xf32> to vector<4x8xf32>
    %49 = vector.shape_cast %48 : vector<4x8xf32> to vector<4x8x1xf32>
    %50 = vector.broadcast %49 : vector<4x8x1xf32> to vector<4x8x8xf32>
    %51 = arith.divf %47, %50 : vector<4x8x8xf32>
    "tpu.trace_start"() <{level = 10 : i32, message = "hqk,khd->qhd"}> : () -> ()
    %cst_21 = arith.constant dense<0.000000e+00> : vector<4x8x8xf32>
    %52 = tpu.matmul %41, %51, %cst_21 {dimension_numbers = #tpu.dot_dimension_numbers<[0], [2], [2], [1], [0, 1, 0, 2, 1, 1], [1], [0]>} : vector<8x4x8xf32>, vector<4x8x8xf32>, vector<4x8x8xf32> -> vector<4x8x8xf32>
    %53 = tpu.transpose %52, [2, 0, 1] : vector<4x8x8xf32> -> vector<8x4x8xf32>
    "tpu.trace_stop"() : () -> ()
    %54 = vector.shape_cast %53 : vector<8x4x8xf32> to vector<8x32xf32>
    %c0_22 = arith.constant 0 : index
    %c0_23 = arith.constant 0 : index
    %55 = vector.load %arg3[%c0_22, %c0_23] : memref<32x32xf32, #tpu.memory_space<vmem>>, vector<32x32xf32>
    %cst_24 = arith.constant dense<0.000000e+00> : vector<8x32xf32>
    %56 = tpu.matmul %54, %55, %cst_24 {dimension_numbers = #tpu.dot_dimension_numbers<[1], [0], [0], [1], [0, 0, 1, 1], [], []>} : vector<8x32xf32>, vector<32x32xf32>, vector<8x32xf32> -> vector<8x32xf32>
    %57 = vector.broadcast %4 : vector<1x32xf32> to vector<8x32xf32>
    %58 = arith.addf %56, %57 : vector<8x32xf32>
    %59 = arith.addf %9, %58 : vector<8x32xf32>
    %cst_25 = arith.constant dense<0.000000e+00> : vector<8xf32>
    %60 = vector.multi_reduction <add>, %59, %cst_25 [1] : vector<8x32xf32> to vector<8xf32>
    %61 = vector.shape_cast %60 : vector<8xf32> to vector<8x1xf32>
    %cst_26 = arith.constant 3.200000e+01 : f32
    %62 = vector.broadcast %cst_26 : f32 to vector<8x1xf32>
    %63 = arith.divf %61, %62 : vector<8x1xf32>
    %64 = vector.broadcast %63 : vector<8x1xf32> to vector<8x32xf32>
    %65 = arith.subf %59, %64 : vector<8x32xf32>
    %66 = arith.mulf %65, %65 : vector<8x32xf32>
    %cst_27 = arith.constant dense<0.000000e+00> : vector<8xf32>
    %67 = vector.multi_reduction <add>, %66, %cst_27 [1] : vector<8x32xf32> to vector<8xf32>
    %68 = vector.shape_cast %67 : vector<8xf32> to vector<8x1xf32>
    %cst_28 = arith.constant 3.200000e+01 : f32
    %69 = vector.broadcast %cst_28 : f32 to vector<8x1xf32>
    %70 = arith.divf %68, %69 : vector<8x1xf32>
    %71 = vector.broadcast %63 : vector<8x1xf32> to vector<8x32xf32>
    %72 = arith.subf %59, %71 : vector<8x32xf32>
    %cst_29 = arith.constant 9.99999974E-6 : f32
    %73 = vector.broadcast %cst_29 : f32 to vector<8x1xf32>
    %74 = arith.addf %70, %73 : vector<8x1xf32>
    %75 = math.rsqrt %74 : vector<8x1xf32>
    %76 = vector.broadcast %75 : vector<8x1xf32> to vector<8x32xf32>
    %77 = arith.mulf %72, %76 : vector<8x32xf32>
    %78 = vector.broadcast %2 : vector<1x32xf32> to vector<8x32xf32>
    %79 = arith.mulf %77, %78 : vector<8x32xf32>
    %80 = vector.broadcast %3 : vector<1x32xf32> to vector<8x32xf32>
    %81 = arith.addf %79, %80 : vector<8x32xf32>
    %c0_30 = arith.constant 0 : index
    %c0_31 = arith.constant 0 : index
    %82 = vector.load %arg4[%c0_30, %c0_31] : memref<32x128xf32, #tpu.memory_space<vmem>>, vector<32x128xf32>
    %cst_32 = arith.constant dense<0.000000e+00> : vector<8x128xf32>
    %83 = tpu.matmul %81, %82, %cst_32 {dimension_numbers = #tpu.dot_dimension_numbers<[1], [0], [0], [1], [0, 0, 1, 1], [], []>} : vector<8x32xf32>, vector<32x128xf32>, vector<8x128xf32> -> vector<8x128xf32>
    %84 = vector.broadcast %7 : vector<1x128xf32> to vector<8x128xf32>
    %85 = arith.addf %83, %84 : vector<8x128xf32>
    %cst_33 = arith.constant 5.000000e-01 : f32
    %86 = vector.broadcast %cst_33 : f32 to vector<8x128xf32>
    %87 = arith.mulf %86, %85 : vector<8x128xf32>
    %cst_34 = arith.constant 0.707106769 : f32
    %88 = vector.broadcast %cst_34 : f32 to vector<8x128xf32>
    %89 = arith.mulf %85, %88 : vector<8x128xf32>
    %90 = math.erf %89 : vector<8x128xf32>
    %cst_35 = arith.constant 1.000000e+00 : f32
    %91 = vector.broadcast %cst_35 : f32 to vector<8x128xf32>
    %92 = arith.addf %91, %90 : vector<8x128xf32>
    %93 = arith.mulf %87, %92 : vector<8x128xf32>
    %c0_36 = arith.constant 0 : index
    %c0_37 = arith.constant 0 : index
    %94 = vector.load %arg5[%c0_36, %c0_37] : memref<128x32xf32, #tpu.memory_space<vmem>>, vector<128x32xf32>
    %cst_38 = arith.constant dense<0.000000e+00> : vector<8x32xf32>
    %95 = tpu.matmul %93, %94, %cst_38 {dimension_numbers = #tpu.dot_dimension_numbers<[1], [0], [0], [1], [0, 0, 1, 1], [], []>} : vector<8x128xf32>, vector<128x32xf32>, vector<8x32xf32> -> vector<8x32xf32>
    %96 = vector.broadcast %5 : vector<1x32xf32> to vector<8x32xf32>
    %97 = arith.addf %95, %96 : vector<8x32xf32>
    %98 = arith.addf %59, %97 : vector<8x32xf32>
    %c0_39 = arith.constant 0 : index
    %c0_40 = arith.constant 0 : index
    %c0_41 = arith.constant 0 : index
    %99 = vector.load %arg7[%c0_39, %c0_40, %c0_41] : memref<1x8x32xf32, #tpu.memory_space<vmem>>, vector<1x8x32xf32>
    %100 = vector.shape_cast %99 : vector<1x8x32xf32> to vector<8x32xf32>
    %101 = vector.shape_cast %98 : vector<8x32xf32> to vector<1x8x32xf32>
    tpu.vector_store %arg7[%c0_39, %c0_40, %c0_41], %101 {strides = array<i32>} : memref<1x8x32xf32, #tpu.memory_space<vmem>>, vector<1x8x32xf32>,
    return
  }
  func.func @transform_0(%arg0: i32) -> (i32, i32, i32) {
    %c0_i32 = arith.constant 0 : i32
    %c0_i32_0 = arith.constant 0 : i32
    %c0_i32_1 = arith.constant 0 : i32
    return %arg0, %c0_i32, %c0_i32_0 : i32, i32, i32
  }
  func.func @transform_1(%arg0: i32) -> (i32, i32) {
    %c0_i32 = arith.constant 0 : i32
    %c0_i32_0 = arith.constant 0 : i32
    %c0_i32_1 = arith.constant 0 : i32
    return %c0_i32, %c0_i32_0 : i32, i32
  }
  func.func @transform_2(%arg0: i32) -> (i32, i32) {
    %c0_i32 = arith.constant 0 : i32
    %c0_i32_0 = arith.constant 0 : i32
    %c0_i32_1 = arith.constant 0 : i32
    return %c0_i32, %c0_i32_0 : i32, i32
  }
  func.func @transform_3(%arg0: i32) -> (i32, i32) {
    %c0_i32 = arith.constant 0 : i32
    %c0_i32_0 = arith.constant 0 : i32
    %c0_i32_1 = arith.constant 0 : i32
    return %c0_i32, %c0_i32_0 : i32, i32
  }
  func.func @transform_4(%arg0: i32) -> (i32, i32) {
    %c0_i32 = arith.constant 0 : i32
    %c0_i32_0 = arith.constant 0 : i32
    %c0_i32_1 = arith.constant 0 : i32
    return %c0_i32, %c0_i32_0 : i32, i32
  }
  func.func @transform_5(%arg0: i32) -> (i32, i32) {
    %c0_i32 = arith.constant 0 : i32
    %c0_i32_0 = arith.constant 0 : i32
    %c0_i32_1 = arith.constant 0 : i32
    return %c0_i32, %c0_i32_0 : i32, i32
  }
  func.func @transform_6(%arg0: i32) -> (i32, i32, i32) {
    %c0_i32 = arith.constant 0 : i32
    %c0_i32_0 = arith.constant 0 : i32
    %c0_i32_1 = arith.constant 0 : i32
    return %arg0, %c0_i32, %c0_i32_0 : i32, i32, i32
  }
}

</mosaic_0001>

<bundles_post_ra>
// kernel: tpu_custom_call.1
= control target key start
LH: loop header
LB: loop body
LE: loop exit
PB: predicated region body
PF: predicated region fallthrough
CT: control target
= control target key end

     0   :  { %11 = vsyncpa [#allocation3], 0  ;;  %s1909_s0 = inlined_call_operand.vmem [shape: f32[2,8,32], index: 0, kind: input, shape index: {}]   ;;  %s1910_s1 = inlined_call_operand.vmem [shape: f32[32,96], index: 1, kind: input, shape index: {}]   ;;  %s1911_s2 = inlined_call_operand.vmem [shape: f32[32,32], index: 2, kind: input, shape index: {}]   ;;  %s1912_s3 = inlined_call_operand.vmem [shape: f32[32,128], index: 3, kind: input, shape index: {}]   ;;  %s1913_s4 = inlined_call_operand.vmem [shape: f32[128,32], index: 4, kind: input, shape index: {}]   ;;  %s1914_s5 = inlined_call_operand.vmem [shape: f32[8,128], index: 5, kind: input, shape index: {}]   ;;  %s1915_s6 = inlined_call_operand.hbm [shape: f32[2,8,32], index: 6, kind: output, shape index: {}]  }
   0x1   :  { %13 = vsyncpa [#allocation3 + $0x1], 0  ;;  %s1622_s21 = smov 0   ;;  %s1624_s22 = smov 0  }
   0x2   :  { %s1626_s23 = smov 0   ;;  %s1628_s24 = smov 0  }
   0x3 LB: > { %s1643_s25 = sadd.s32 4294967295, %s1574_s24   ;;  %s1391_s26 = sadd.s32 4294967294, %s1574_s24   ;;  %s1574_s24 = sphi %s1628_s24, %s1921_s24   ;;  %s1570_s23 = sphi %s1626_s23, %s1920_s23   ;;  %s1566_s22 = sphi %s1624_s22, %s1919_s22   ;;  %s1562_s21 = sphi %s1622_s21, %s1918_s21  }
   0x4   : > { %s1647_s27 = sadd.s32 1, %s1574_s24   ;;  %s157_s28 = sadd.s32 1, %s1570_s23 }
   0x5   : > { %s154_s29 = ssub.s32 %s1574_s24, %s1647_s27  ;;  %p167_p0 = scmp.ne.s32.totalorder %s1570_s23, %s1566_s22 }
   0x6   : > { %p155_p1 = scmp.eq.s32.totalorder %s154_s29, 0  ;;  %p168_p2 = scmp.eq.s32.totalorder %s1643_s25, 1 }
   0x7   : > { %p173_p3 = scmp.ne.s32.totalorder %s1566_s22, %s1562_s21  ;;  %p174_p4 = scmp.eq.s32.totalorder %s1391_s26, 1 }
   0x8   : > { %s1658_s30 = scalar_select %p155_p1, %s1570_s23, %s157_s28  }
   0x9   : > { %p1660_p5 = por %p168_p2, %p167_p0  ;;  %p1664_p6 = por %p174_p4, %p173_p3 }
   0xa   : > { %p1394_p7 = scmp.ge.s32.totalorder %s1574_s24, 1  ;;  %p214_p8 = scmp.lt.s32.totalorder %s1574_s24, 3 }
   0xc   : > { %p215_p9 = pnand %p1394_p7, %p214_p8 }
   0xd   : > { %p243_p10 = scmp.lt.s32.totalorder (!%p215_p9), %s1643_s25, 1  ;;  %s1578_s14 = smov (!%p215_p9), 112  }
   0xe   : > { %218 = sbr.rel (%p215_p9) target bundleno = 2533 (0x9e5), region = 44  ;;  %s1579_s15 = smov (!%p215_p9), 120  }
   0xf   : > { %s1580_s16 = smov (!%p215_p9), 96   ;;  %s1581_s17 = smov (!%p215_p9), 64  }
  0x10   : > { %s1584_s18 = smov (!%p215_p9), 24   ;;  %s1585_s19 = smov (!%p215_p9), 16  }
  0x11   : > { %s1586_s20 = smov (!%p215_p9), 8  }
  0x13   : > { %s244_s9 = scalar_select %p243_p10, %s1643_s25, 1  ;;  %vm256_vm0 = vcmask 261120   ;;  %v1576_v2 = vmov 32.0   ;;  %v293_v14 = vld [vmem:[%s1910_s1 + $0x18] sm:$0xff]  ;;  %v292_v15 = vld [vmem:[%s1910_s1 + $0x10] sm:$0xff]  ;;  %v291_v16 = vld [vmem:[%s1910_s1 + $0x8] sm:$0xff] }
  0x14   : > { %1488 = vrcp.f32 %v1576_v2  ;;  %310 = vmatpush.msra.mxu1 %v293_v14  ;;  %v290_v17 = vld [vmem:[%s1910_s1] sm:$0xff]  ;;  %vm465_vm5 = vcmask 64512  }
  0x15   : > { %s1396_s10 = sshll.u32 %s244_s9, 3  ;;  %v1480_v27 = vld [vmem:[%s1914_s5] ss:$0 sm:$0xff]  ;;  %v1481_v30 = vld [vmem:[%s1914_s5 + $0x1] ss:$0 sm:$0xff] }
  0x16   : > { %s246_s13 = scalar_lea.vmem %s1909_s0, %s1396_s10  ;;  %311 = vmatpush.msra.mxu1 %v292_v15  ;;  %v1482_v33 = vld [vmem:[%s1914_s5 + $0x6] ss:$0 sm:$0xff] }
  0x17   : > { %v1675_v0 = vld [vmem:[%s246_s13] sm:$0xff]  ;;  %s1577_s13 = smov 104  }
  0x18   : > { %v257_v1 = vsel %vm256_vm0, %v1675_v0, 0.0  ;;  %312 = vmatpush.msra.mxu1 %v291_v16 }
  0x19   : > { %258 = vadd.xlane.f32.xlu0 %v257_v1 }
  0x1a   : > { %v1489_v3 = vpop.eup %1488  ;;  %313 = vmatpush.msra.mxu1 %v290_v17 }
  0x1b   : > { %v261_v4 = vmul.f32 32.0, %v1489_v3  ;;  %vm265_vm1 = vweird.f32 %v1489_v3 }
  0x1d   : > { %v262_v5 = vsub.f32 1.0, %v261_v4 }
  0x1f   : > { %v263_v6 = vmul.f32 %v1489_v3, %v262_v5 }
  0x21   : > { %v264_v7 = vadd.f32 %v1489_v3, %v263_v6 }
  0x23   : > { %v1679_v8 = vsel %vm265_vm1, %v1489_v3, %v264_v7 }
  0x8c   : > { %v259_v9 = vpop.xlane.xlu0 %258 }
  0x8d   : > { %v267_v10 = vmul.f32 %v1679_v8, %v259_v9 }
  0x8f   : > { %v268_v11 = vsub.f32 %v1675_v0, %v267_v10 }
  0x91   : > { %v269_v12 = vmul.f32 %v268_v11, %v268_v11 }
  0x93   : > { %v270_v13 = vsel %vm256_vm0, %v269_v12, 0.0 }
  0x94   : > { %271 = vadd.xlane.f32.xlu0 %v270_v13 }
 0x107   : > { %v272_v18 = vpop.xlane.xlu0 %271 }
 0x108   : > { %v273_v19 = vmul.f32 %v272_v18, %v1679_v8 }
 0x10a   : > { %v274_v20 = vadd.f32 1e-05, %v273_v19 }
 0x10c   : > { %1490 = vrsqrt.f32 %v274_v20  ;;  %vm281_vm3 = vweird.f32 %v274_v20 }
 0x112   : > { %v1491_v21 = vpop.eup %1490 }
 0x113   : > { %v276_v22 = vmul.f32 %v1491_v21, %v274_v20  ;;  %vm282_vm2 = vweird.f32 %v1491_v21 }
 0x114   : > { %vm283_vm4 = vmor %vm281_vm3, %vm282_vm2 }
 0x115   : > { %v277_v23 = vmul.f32 %v1491_v21, %v276_v22 }
 0x117   : > { %v278_v24 = vmul.f32 0.5, %v277_v23 }
 0x119   : > { %v279_v25 = vsub.f32 1.5, %v278_v24 }
 0x11b   : > { %v280_v26 = vmul.f32 %v1491_v21, %v279_v25 }
 0x11d   : > { %v284_v28 = vsel %vm283_vm4, %v1491_v21, %v280_v26 }
 0x11e   : > { %v285_v29 = vmul.f32 %v284_v28, %v268_v11 }
 0x120   : > { %v287_v31 = vmul.f32 %v1480_v27, %v285_v29 }
 0x122   : > { %v289_v32 = vadd.f32 %v1481_v30, %v287_v31 }
 0x124   : > { %1397 = vmatmul.msk.f32.vlgmr.msra.gmra.mxu1 %vm256_vm0, %v289_v32 }
 0x1a1   : > { %v315_v34 = vpop.f32.mrf.mxu1 }
 0x1a2   : > { %v316_v35 = vadd.f32 %v1482_v33, %v315_v34 }
 0x1a4   : > { %323 = vrot.lane.b32.xlu2 %v316_v35, %s1577_s13  ;;  %321 = vrot.lane.b32.xlu1 %v316_v35, %s1578_s14 }
 0x1ac   : > { %319 = vrot.lane.b32.xlu1 %v316_v35, %s1579_s15 }
 0x1fe   : > { %v324_v36 = vpop.permute.xlu2 %323 }
 0x1ff   : > { %331 = vrot.lane.b32.xlu1 %v324_v36, %s1580_s16 }
 0x216   : > { %v322_v37 = vpop.permute.xlu1 %321 }
 0x217   : > { %v1468_v38 = vpack.i.bf16 %v322_v37, %v316_v35 }
 0x219   : > { %1469 = vrot.lane.b32.xlu2 %v1468_v38, %s1580_s16 }
 0x21e   : > { %v1707_v39 = vpop.permute.xlu1 %319 }
 0x21f   : > { %327 = vrot.lane.b32.xlu0 %v1707_v39, %s1580_s16 }
 0x271   : > { %v332_v40 = vpop.permute.xlu1 %331 }
 0x272   : > { %433 = vxpose.xlu0.b32.start.end [1/1] (short) (narrow) %v332_v40, 8 }
 0x273   : > { %v1470_v41 = vpop.permute.xlu2 %1469 }
 0x274   : > { %1474 = vxpose.xlu2.b32.start.end [1/1] (short) (narrow) %v1470_v41, 8 }
 0x291   : > { %v328_v42 = vpop.permute.xlu0 %327 }
 0x292   : > { %369 = vxpose.xlu1.b32.start.end [1/1] (short) (narrow) %v328_v42, 8 }
 0x30d   : > { %v1475_v43 = vpop.trf.xlu2 }
 0x30e   : > { %v1476_v44 = vunpack.i.l.bf16 %v1475_v43  ;;  %v1479_v45 = vunpack.i.h.bf16 %v1475_v43 }
 0x310   : > { %483 = vmatpush.msrb.mxu1 %v1476_v44  ;;  %527 = vmatpush.msra.mxu3 %v1479_v45 }
 0x311   : > { %1398 = vmatmul.msk.f32.vlgmr.msrb.gmra.mxu1 %vm465_vm5, %v316_v35  ;;  %1400 = vmatmul.msk.f32.vlgmr.msra.gmra.mxu3 %vm465_vm5, %v322_v37 }
 0x316   : > { %v449_v46 = vpop.trf.xlu0 }
 0x317   : > { %549 = vmatpush.msra.mxu1 %v449_v46 }
 0x319   : > { %1401 = vmatmul.msk.f32.vlgmr.msra.gmra.mxu1 %vm465_vm5, %v324_v36 }
 0x336   : > { %v385_v47 = vpop.trf.xlu1 }
 0x337   : > { %505 = vmatpush.msra.mxu2 %v385_v47 }
 0x338   : > { %1399 = vmatmul.msk.f32.vlgmr.msra.gmra.mxu2 %vm465_vm5, %v1707_v39 }
 0x38e   : > { %v485_v48 = vpop.f32.mrf.mxu1 }
 0x38f   : > { %v554_v49 = vsel %vm465_vm5, %v485_v48, -inf }
 0x390   : > { %555 = vmax.xlane.f32.xlu2 %v554_v49 }
 0x394   : > { %v529_v50 = vpop.f32.mrf.mxu3 }
 0x395   : > { %v560_v51 = vsel %vm465_vm5, %v529_v50, -inf }
 0x396   : > { %561 = vmax.xlane.f32.xlu0 %v560_v51  ;;  %v551_v52 = vpop.f32.mrf.mxu1 }
 0x397   : > { %v563_v53 = vsel %vm465_vm5, %v551_v52, -inf }
 0x398   : > { %564 = vmax.xlane.f32.xlu2 %v563_v53 }
 0x3b0   : > { %650 = vrot.lane.b32.xlu2 %v316_v35, %s1581_s17 }
 0x3b8   : > { %656 = vrot.lane.b32.xlu2 %v324_v36, %s1581_s17 }
 0x3bb   : > { %v507_v54 = vpop.f32.mrf.mxu2 }
 0x3bc   : > { %v557_v55 = vsel %vm465_vm5, %v507_v54, -inf }
 0x3bd   : > { %558 = vmax.xlane.f32.xlu1 %v557_v55 }
 0x3d6   : > { %654 = vrot.lane.b32.xlu1 %v322_v37, %s1581_s17 }
 0x403   : > { %v556_v56 = vpop.xlane.xlu2 %555 }
 0x404   : > { %v566_v57 = vsub.f32 %v485_v48, %v556_v56 }
 0x406   : > { %v570_v58 = vmul.f32 1.442695, %v566_v57 }
 0x408   : > { %1492 = vpow2.f32 %v570_v58 }
 0x409   : > { %v562_v59 = vpop.xlane.xlu0 %561 }
 0x40a   : > { %v568_v60 = vsub.f32 %v529_v50, %v562_v59 }
 0x40b   : > { %v565_v61 = vpop.xlane.xlu2 %564 }
 0x40c   : > { %v574_v62 = vmul.f32 1.442695, %v568_v60  ;;  %v569_v63 = vsub.f32 %v551_v52, %v565_v61 }
 0x40e   : > { %v1493_v1 = vpop.eup %1492  ;;  %1494 = vpow2.f32 %v574_v62  ;;  %v576_v2 = vmul.f32 1.442695, %v569_v63 }
 0x40f   : > { %v578_v3 = vsel %vm465_vm5, %v1493_v1, 0.0 }
 0x410   : > { %1496 = vpow2.f32 %v576_v2  ;;  %579 = vadd.xlane.f32.xlu1 %v578_v3 }
 0x413   : > { %v651_v4 = vpop.permute.xlu2 %650 }
 0x414   : > { %v1723_v5 = vpop.eup %1494  ;;  %662 = vxpose.xlu2.b32.start.end [1/1] (short) (narrow) %v651_v4, 8 }
 0x415   : > { %v584_v9 = vsel %vm465_vm5, %v1723_v5, 0.0 }
 0x416   : > { %v1725_v6 = vpop.eup %1496 }
 0x417   : > { %v587_v7 = vsel %vm465_vm5, %v1725_v6, 0.0 }
 0x418   : > { %588 = vadd.xlane.f32.xlu0 %v587_v7  ;;  %585 = vadd.xlane.f32.xlu1 %v584_v9 }
 0x41b   : > { %v657_v10 = vpop.permute.xlu2 %656 }
 0x41c   : > { %758 = vxpose.xlu2.b32.start.end [1/1] (short) (narrow) %v657_v10, 8 }
 0x430   : > { %v559_v11 = vpop.xlane.xlu1 %558 }
 0x431   : > { %v567_v12 = vsub.f32 %v507_v54, %v559_v11 }
 0x433   : > { %v572_v13 = vmul.f32 1.442695, %v567_v12 }
 0x435   : > { %1498 = vpow2.f32 %v572_v13 }
 0x43b   : > { %v1731_v14 = vpop.eup %1498 }
 0x43c   : > { %v581_v15 = vsel %vm465_vm5, %v1731_v14, 0.0 }
 0x43d   : > { %582 = vadd.xlane.f32.xlu0 %v581_v15 }
 0x448   : > { %v655_v16 = vpop.permute.xlu1 %654 }
 0x451   : > { %652 = vrot.lane.b32.xlu0 %v1707_v39, %s1581_s17  ;;  %s240_s17 = sand.u32 1, %s1566_s22  }
 0x452   : > { %726 = vxpose.xlu1.b32.start.end [1/1] (short) (narrow) %v655_v16, 8 }
 0x483   : > { %v580_v17 = vpop.xlane.xlu1 %579 }
 0x484   : > { %1500 = vrcp.f32 %v580_v17  ;;  %v601_v23 = vand.u32 2147483648, %v580_v17  ;;  %v599_v25 = vand.u32 2147483647, %v580_v17  ;;  %vm595_vm7 = vweird.f32 %v580_v17 }
 0x486   : > { %v602_v28 = vor.u32 1.1754944e-38, %v601_v23  ;;  %vm600_vm9 = vcmp.eq.f32.partialorder %v599_v25, 8.507059e+37 }
 0x48a   : > { %v1501_v18 = vpop.eup %1500 }
 0x48b   : > { %v591_v19 = vmul.f32 %v1501_v18, %v580_v17  ;;  %v589_v20 = vpop.xlane.xlu0 %588  ;;  %v586_v21 = vpop.xlane.xlu1 %585  ;;  %vm596_vm6 = vweird.f32 %v1501_v18 }
 0x48c   : > { %1502 = vrcp.f32 %v589_v20  ;;  %vm597_vm8 = vmor %vm595_vm7, %vm596_vm6  ;;  %v646_v36 = vand.u32 2147483648, %v589_v20  ;;  %v644_v39 = vand.u32 2147483647, %v589_v20  ;;  %v631_v40 = vand.u32 2147483648, %v586_v21 }
 0x48d   : > { %v592_v22 = vsub.f32 1.0, %v591_v19  ;;  %1504 = vrcp.f32 %v586_v21  ;;  %v629_v42 = vand.u32 2147483647, %v586_v21  ;;  %vm640_vm12 = vweird.f32 %v589_v20 }
 0x48e   : > { %v647_v44 = vor.u32 1.1754944e-38, %v646_v36  ;;  %vm625_vm14 = vweird.f32 %v586_v21  ;;  %vm645_vm15 = vcmp.eq.f32.partialorder %v644_v39, 8.507059e+37  ;;  %v632_v47 = vor.u32 1.1754944e-38, %v631_v40 }
 0x48f   : > { %v593_v24 = vmul.f32 %v1501_v18, %v592_v22  ;;  %vm630_vm2 = vcmp.eq.f32.partialorder %v629_v42, 8.507059e+37  ;;  %v1583_v22 = vmov 1934713408  }
 0x490   : > { %v1052_v23 = vunpack.c.l.s4 %v1583_v22  ;;  %v1153_v22 = vld [vmem:[%s1911_s2 + $0x18] sm:$0xff] }
 0x491   : > { %v594_v26 = vadd.f32 %v1501_v18, %v593_v24 }
 0x492   : > { %v1503_v27 = vpop.eup %1502 }
 0x493   : > { %v1505_v29 = vpop.eup %1504  ;;  %v636_v30 = vmul.f32 %v1503_v27, %v589_v20  ;;  %v598_v31 = vsel %vm597_vm8, %v1501_v18, %v594_v26  ;;  %vm641_vm10 = vweird.f32 %v1503_v27  ;;  %vm1023_vm8 = vcmask 1047556  }
 0x494   : > { %v621_v32 = vmul.f32 %v1505_v29, %v586_v21  ;;  %v603_v33 = vsel %vm600_vm9, %v602_v28, %v598_v31  ;;  %vm626_vm11 = vweird.f32 %v1505_v29  ;;  %vm642_vm13 = vmor %vm640_vm12, %vm641_vm10  ;;  %v1053_v28 = vunpack.c.0.s8 %v1052_v23  ;;  %v1152_v23 = vld [vmem:[%s1911_s2 + $0x10] sm:$0xff] }
 0x495   : > { %v637_v34 = vsub.f32 1.0, %v636_v30  ;;  %v604_v35 = vmul.f32 %v1493_v1, %v603_v33  ;;  %vm627_vm1 = vmor %vm625_vm14, %vm626_vm11  ;;  %vm1146_vm9 = vcmask 130048   ;;  %vm1148_vm10 = vcmask 195584  }
 0x496   : > { %v622_v37 = vsub.f32 1.0, %v621_v32 }
 0x497   : > { %v638_v38 = vmul.f32 %v1503_v27, %v637_v34  ;;  %1402 = vmatpush.xpose.msk.msrb.mxu2 %vm465_vm5, %v604_v35 }
 0x498   : > { %v623_v41 = vmul.f32 %v1505_v29, %v622_v37 }
 0x499   : > { %v639_v43 = vadd.f32 %v1503_v27, %v638_v38 }
 0x49a   : > { %v624_v45 = vadd.f32 %v1505_v29, %v623_v41 }
 0x49b   : > { %v643_v46 = vsel %vm642_vm13, %v1503_v27, %v639_v43 }
 0x49c   : > { %v648_v48 = vsel %vm645_vm15, %v647_v44, %v643_v46  ;;  %v628_v49 = vsel %vm627_vm1, %v1505_v29, %v624_v45 }
 0x49d   : > { %v633_v50 = vsel %vm630_vm2, %v632_v47, %v628_v49  ;;  %v649_v51 = vmul.f32 %v1725_v6, %v648_v48 }
 0x49e   : > { %v634_v52 = vmul.f32 %v1723_v5, %v633_v50 }
 0x49f   : > { %1408 = vmatpush.xpose.msk.msrb.mxu1 %vm465_vm5, %v649_v51 }
 0x4a0   : > { %1406 = vmatpush.xpose.msk.msra.mxu2 %vm465_vm5, %v634_v52 }
 0x4ad   : > { %v678_v54 = vpop.trf.xlu2 }
 0x4ae   : > { %1403 = vmatmul.msk.f32.vlgmr.msrb.gmra.mxu2 %vm465_vm5, %v678_v54 }
 0x4af   : > { %1170 = vmatpush.msrb.mxu2 %v1153_v22 }
 0x4b0   : > { %v583_v53 = vpop.xlane.xlu0 %582 }
 0x4b1   : > { %1506 = vrcp.f32 %v583_v53  ;;  %v616_v59 = vand.u32 2147483648, %v583_v53  ;;  %v614_v61 = vand.u32 2147483647, %v583_v53  ;;  %vm610_vm4 = vweird.f32 %v583_v53  ;;  %1171 = vmatpush.msrb.mxu2 %v1152_v23 }
 0x4b3   : > { %v617_v63 = vor.u32 1.1754944e-38, %v616_v59  ;;  %vm615_vm7 = vcmp.eq.f32.partialorder %v614_v61, 8.507059e+37 }
 0x4b5   : > { %v774_v57 = vpop.trf.xlu2 }
 0x4b6   : > { %1409 = vmatmul.msk.f32.vlgmr.msrb.gmra.mxu1 %vm465_vm5, %v774_v57 }
 0x4b7   : > { %v1507_v55 = vpop.eup %1506 }
 0x4b8   : > { %v606_v56 = vmul.f32 %v1507_v55, %v583_v53  ;;  %vm611_vm3 = vweird.f32 %v1507_v55 }
 0x4b9   : > { %vm612_vm6 = vmor %vm610_vm4, %vm611_vm3 }
 0x4ba   : > { %v607_v58 = vsub.f32 1.0, %v606_v56 }
 0x4bc   : > { %v608_v60 = vmul.f32 %v1507_v55, %v607_v58 }
 0x4be   : > { %v609_v62 = vadd.f32 %v1507_v55, %v608_v60 }
 0x4c0   : > { %v613_v1 = vsel %vm612_vm6, %v1507_v55, %v609_v62 }
 0x4c1   : > { %v618_v2 = vsel %vm615_vm7, %v617_v63, %v613_v1 }
 0x4c2   : > { %v619_v3 = vmul.f32 %v1731_v14, %v618_v2  ;;  %v1582_v14 = vmov 1983009808  }
 0x4c3   : > { %v653_v4 = vpop.permute.xlu0 %652  ;;  %v1028_v15 = vunpack.c.l.s4 %v1582_v14 }
 0x4c4   : > { %1404 = vmatpush.xpose.msk.msrb.mxu3 %vm465_vm5, %v619_v3  ;;  %694 = vxpose.xlu0.b32.start.end [1/1] (short) (narrow) %v653_v4, 8 }
 0x4c5   : > { %v1029_v19 = vunpack.c.0.s8 %v1028_v15 }
 0x4f6   : > { %v742_v5 = vpop.trf.xlu1 }
 0x4f7   : > { %1407 = vmatmul.msk.f32.vlgmr.msra.gmra.mxu2 %vm465_vm5, %v742_v5 }
 0x531   : > { %v813_v6 = vpop.f32.mrf.mxu2 }
 0x532   : > { %894 = vxpose.xlu2.b32.start.end [1/1] (short) (narrow) %v813_v6, 8 }
 0x533   : > { %v891_v7 = vpop.f32.mrf.mxu1 }
 0x534   : > { %990 = vxpose.xlu0.b32.start.end [1/1] (short) (narrow) %v891_v7, 8 }
 0x568   : > { %v710_v9 = vpop.trf.xlu0 }
 0x569   : > { %1405 = vmatmul.msk.f32.vlgmr.msrb.gmra.mxu3 %vm465_vm5, %v710_v9 }
 0x57a   : > { %v865_v10 = vpop.f32.mrf.mxu2 }
 0x57b   : > { %958 = vxpose.xlu0.b32.start.end [1/1] (short) (narrow) %v865_v10, 8 }
 0x5cb   : > { %v910_v16 = vpop.trf.xlu2 }
 0x5cc   : > { %v1025_v18 = vrot.slane %v910_v16, 4 }
 0x5d8   : > { %v1006_v12 = vpop.trf.xlu0 }
 0x5d9   : > { %v1035_v25 = vrot.slane %v1006_v12, 4 }
 0x5ec   : > { %v839_v11 = vpop.f32.mrf.mxu3 }
 0x5ed   : > { %926 = vxpose.xlu2.b32.start.end [1/1] (short) (narrow) %v839_v11, 8 }
 0x61f   : > { %v974_v13 = vpop.trf.xlu0 }
 0x620   : > { %v1022_v17 = vrot.slane %v974_v13, 4  ;;  %v1026_v21 = vsel %vm1023_vm8, %v974_v13, %v1025_v18 }
 0x621   : > { %v1034_v26 = vperm.slane %v1026_v21, %v1029_v19 }
 0x622   : > { %v1024_v20 = vsel %vm1023_vm8, %v1022_v17, %v910_v16 }
 0x623   : > { %v1030_v24 = vperm.slane %v1024_v20, %v1029_v19  ;;  %v1061_v34 = vrot.slane %v1034_v26, 4 }
 0x625   : > { %v1049_v31 = vrot.slane %v1030_v24, 4 }
 0x686   : > { %v942_v27 = vpop.trf.xlu2 }
 0x687   : > { %v1036_v29 = vsel %vm1023_vm8, %v1035_v25, %v942_v27  ;;  %v1037_v30 = vrot.slane %v942_v27, 4  ;;  %v1150_v25 = vld [vmem:[%s1911_s2] sm:$0xff] }
 0x688   : > { %v1042_v32 = vperm.slane %v1036_v29, %v1029_v19 }
 0x689   : > { %v1038_v33 = vsel %vm1023_vm8, %v1006_v12, %v1037_v30 }
 0x68a   : > { %v1046_v35 = vperm.slane %v1038_v33, %v1029_v19  ;;  %v1047_v36 = vrot.slane %v1042_v32, 4  ;;  %v1050_v37 = vsel %vm1023_vm8, %v1042_v32, %v1049_v31  ;;  %v1483_v32 = vld [vmem:[%s1914_s5 + $0x4] ss:$0 sm:$0xff] }
 0x68b   : > { %v1058_v38 = vperm.slane %v1050_v37, %v1053_v28 }
 0x68c   : > { %v1048_v39 = vsel %vm1023_vm8, %v1047_v36, %v1030_v24  ;;  %v1059_v40 = vrot.slane %v1046_v35, 4  ;;  %v1062_v41 = vsel %vm1023_vm8, %v1046_v35, %v1061_v34  ;;  %v1151_v24 = vld [vmem:[%s1911_s2 + $0x8] sm:$0xff] }
 0x68d   : > { %v1054_v42 = vperm.slane %v1048_v39, %v1053_v28  ;;  %v1070_v43 = vperm.slane %v1062_v41, %v1053_v28  ;;  %v1073_v44 = vrot.slane %v1058_v38, 4  ;;  %1172 = vmatpush.msrb.mxu2 %v1151_v24  ;;  %v1279_v24 = vld [vmem:[%s1913_s4 + $0x10] sm:$0xff] }
 0x68e   : > { %v1060_v45 = vsel %vm1023_vm8, %v1059_v40, %v1034_v26 }
 0x68f   : > { %v1066_v46 = vperm.slane %v1060_v45, %v1053_v28  ;;  %v1071_v47 = vrot.slane %v1054_v42, 4  ;;  %v1074_v48 = vsel %vm1023_vm8, 0.0, %v1073_v44  ;;  %v1077_v49 = vrot.slane %v1070_v43, 4  ;;  %1173 = vmatpush.msrb.mxu2 %v1150_v25  ;;  %v1206_v43 = vld [vmem:[%s1912_s3 + $0x8] sm:$0xff] }
 0x690   : > { %v1079_v50 = vsel %vm1023_vm8, %v1073_v44, %v1054_v42  ;;  %v1084_v51 = vrot.slane %v1074_v48, 4  ;;  %v1208_v42 = vld [vmem:[%s1912_s3 + $0x18] sm:$0xff]  ;;  %v1205_v44 = vld [vmem:[%s1912_s3] sm:$0xff] }
 0x691   : > { %v1072_v52 = vsel %vm1023_vm8, 0.0, %v1071_v47  ;;  %v1075_v53 = vrot.slane %v1066_v46, 4  ;;  %v1078_v54 = vsel %vm1023_vm8, 0.0, %v1077_v49  ;;  %v1083_v55 = vperm.slane %v1079_v50, %v1029_v19  ;;  %1225 = vmatpush.msra.mxu3 %v1208_v42 }
 0x692   : > { %v1095_v56 = vrot.slane %v1078_v54, 4  ;;  %v1085_v57 = vsel %vm1023_vm8, %v1084_v51, %v1072_v52  ;;  %v1090_v58 = vsel %vm1023_vm8, %v1077_v49, %v1066_v46  ;;  %v1484_v54 = vld [vmem:[%s1914_s5 + $0x2] ss:$0 sm:$0xff] }
 0x693   : > { %v1076_v59 = vsel %vm1023_vm8, 0.0, %v1075_v53  ;;  %v1089_v60 = vperm.slane %v1085_v57, %v1029_v19  ;;  %v1094_v61 = vperm.slane %v1090_v58, %v1029_v19  ;;  %v1103_v62 = vrot.slane %v1083_v55, 4 }
 0x694   : > { %v1096_v63 = vsel %vm1023_vm8, %v1095_v56, %v1076_v59  ;;  %v1292_v59 = vld [vmem:[%s1913_s4 + $0x78] sm:$0xff] }
 0x695   : > { %v1100_v1 = vperm.slane %v1096_v63, %v1029_v19  ;;  %v1104_v2 = vsel %vm1023_vm8, %v1089_v60, %v1103_v62  ;;  %v1115_v3 = vrot.slane %v1094_v61, 4  ;;  %v1101_v4 = vrot.slane %v1089_v60, 4  ;;  %1294 = vmatpush.msra.mxu0 %v1292_v59  ;;  %v1291_v60 = vld [vmem:[%s1913_s4 + $0x70] sm:$0xff]  ;;  %v1486_v62 = vld [vmem:[%s1914_s5 + $0x7] ss:$0 sm:$0xff] }
 0x696   : > { %v1112_v5 = vperm.slane %v1104_v2, %v1053_v28  ;;  %v1289_v63 = vld [vmem:[%s1913_s4 + $0x60] sm:$0xff] }
 0x697   : > { %v1116_v6 = vsel %vm1023_vm8, %v1100_v1, %v1115_v3  ;;  %v1102_v7 = vsel %vm1023_vm8, %v1101_v4, %v1083_v55  ;;  %v1113_v9 = vrot.slane %v1100_v1, 4  ;;  %1295 = vmatpush.msra.mxu0 %v1291_v60  ;;  %v1288_v1 = vld [vmem:[%s1913_s4 + $0x58] sm:$0xff]  ;;  %v1287_v3 = vld [vmem:[%s1913_s4 + $0x50] sm:$0xff] }
 0x698   : > { %v1124_v10 = vperm.slane %v1116_v6, %v1053_v28  ;;  %v1131_v11 = vrot.slane %v1112_v5, 4  ;;  %v1108_v12 = vperm.slane %v1102_v7, %v1053_v28  ;;  %v1285_v7 = vld [vmem:[%s1913_s4 + $0x40] sm:$0xff] }
 0x699   : > { %v1114_v13 = vsel %vm1023_vm8, %v1113_v9, %v1094_v61  ;;  %v1290_v61 = vld [vmem:[%s1913_s4 + $0x68] sm:$0xff] }
 0x69a   : > { %v1132_v14 = vsel %vm1023_vm8, %v1124_v10, %v1131_v11  ;;  %v1129_v15 = vrot.slane %v1124_v10, 4  ;;  %v1120_v16 = vperm.slane %v1114_v13, %v1053_v28  ;;  %v1127_v17 = vrot.slane %v1108_v12, 4  ;;  %1296 = vmatpush.msra.mxu0 %v1290_v61  ;;  %v1284_v10 = vld [vmem:[%s1913_s4 + $0x38] sm:$0xff] }
 0x69b   : > { %1142 = vrot.lane.b32.xlu2 %v1132_v14, %s1584_s18  ;;  %s1395_s18 = sshll.u32 %s240_s17, 3 }
 0x69c   : > { %v1130_v18 = vsel %vm1023_vm8, %v1129_v15, %v1112_v5  ;;  %v1125_v19 = vrot.slane %v1120_v16, 4  ;;  %v1128_v20 = vsel %vm1023_vm8, %v1120_v16, %v1127_v17  ;;  %1297 = vmatpush.msra.mxu0 %v1289_v63  ;;  %v1286_v5 = vld [vmem:[%s1913_s4 + $0x48] sm:$0xff]  ;;  %s242_s10 = scalar_lea.vmem [#allocation2], %s1395_s18  ;;  %s1532_s18 = scalar_lea.hbm %s1915_s6, 16 }
 0x69d   : > { %1138 = vrot.lane.b32.xlu0 %v1130_v18, %s1585_s19  ;;  %1134 = vrot.lane.b32.xlu1 %v1128_v20, %s1586_s20  ;;  %v1282_v15 = vld [vmem:[%s1913_s4 + $0x28] sm:$0xff]  ;;  %v1281_v18 = vld [vmem:[%s1913_s4 + $0x20] sm:$0xff]  ;;  %s1414_s19 = sshll.u32 %s1643_s25, 3  ;;  %s1329_s11 = sshll.u32 %s242_s10, 4  ;;  %s1330_s11 = int_to_ptr.vmem [resolvable:$true] %s1329_s11 }
 0x69e   : > { %v1126_v21 = vsel %vm1023_vm8, %v1125_v19, %v1108_v12  ;;  %1298 = vmatpush.msra.mxu0 %v1288_v1  ;;  %v1283_v12 = vld [vmem:[%s1913_s4 + $0x30] sm:$0xff]  ;;  %s1327_s9 = scalar_lea.hbm %s1915_s6, %s1414_s19  ;;  %s1317_s25 = scalar_lea.sflag [#allocation3], %s240_s17 }
 0x69f   : > { %s1331_s12 = sshll.u32 %s1327_s9, 4  ;;  %s1332_s12 = int_to_ptr.hbm [resolvable:$true] %s1331_s12 }
 0x6a0   : > { %1299 = vmatpush.msra.mxu0 %v1287_v3  ;;  %s1526_s13 = sshra.s32 %s1332_s12, 4  ;;  %s1527_s13 = int_to_ptr.hbm [resolvable:$true] %s1526_s13 }
 0x6a1   : > { %s1528_s14 = scalar_lea.hbm %s1527_s13, 8  ;;  %p1533_p0 = scmp.lt.s32.totalorder %s1527_s13, %s1915_s6 }
 0x6a2   : > { %1300 = vmatpush.msra.mxu0 %v1286_v5  ;;  %p1529_p11 = scmp.ne.s32.totalorder %s1527_s13, %s1528_s14  ;;  %p1534_p1 = scmp.lt.s32.totalorder %s1532_s18, %s1528_s14 }
 0x6a4   : > { %1301 = vmatpush.msra.mxu0 %v1285_v7  ;;  %p1530_p12 = pnand %p1529_p11, %p1660_p5  ;;  %p1535_p2 = por %p1534_p1, %p1533_p0 }
 0x6a6   : > { %1302 = vmatpush.msra.mxu0 %v1284_v10  ;;  %p1531_p13 = pneg %p1530_p12 }
 0x6a8   : > { %1303 = vmatpush.msra.mxu0 %v1283_v12  ;;  %p1536_p3 = pnand %p1535_p2, %p1531_p13 }
 0x6aa   : > { %1304 = vmatpush.msra.mxu0 %v1282_v15 }
 0x6ac   : > { %1305 = vmatpush.msra.mxu0 %v1281_v18 }
 0x6f5   : > { %v1143_v29 = vpop.permute.xlu2 %1142 }
 0x70f   : > { %v1139_v26 = vpop.permute.xlu0 %1138  ;;  %v1135_v27 = vpop.permute.xlu1 %1134 }
 0x710   : > { %v1145_v28 = vsel %vm465_vm5, %v1126_v21, %v1135_v27  ;;  %v1280_v21 = vld [vmem:[%s1913_s4 + $0x18] sm:$0xff] }
 0x711   : > { %v1147_v30 = vsel %vm1146_vm9, %v1145_v28, %v1139_v26  ;;  %1306 = vmatpush.msra.mxu0 %v1280_v21  ;;  %v1278_v26 = vld [vmem:[%s1913_s4 + $0x8] sm:$0xff] }
 0x712   : > { %v1149_v31 = vsel %vm1148_vm10, %v1147_v30, %v1143_v29  ;;  %v1277_v29 = vld [vmem:[%s1913_s4] sm:$0xff] }
 0x713   : > { %1410 = vmatmul.msk.f32.vlgmr.msrb.gmra.mxu2 %vm256_vm0, %v1149_v31  ;;  %1307 = vmatpush.msra.mxu0 %v1279_v24 }
 0x715   : > { %1308 = vmatpush.msra.mxu0 %v1278_v26 }
 0x717   : > { %1309 = vmatpush.msra.mxu0 %v1277_v29 }
 0x796   : > { %v1175_v33 = vpop.f32.mrf.mxu2 }
 0x797   : > { %v1176_v34 = vadd.f32 %v1483_v32, %v1175_v33 }
 0x799   : > { %v1790_v35 = vadd.f32 %v1176_v34, %v1675_v0  ;;  %v1207_v0 = vld [vmem:[%s1912_s3 + $0x10] sm:$0xff] }
 0x79a   : > { %1226 = vmatpush.msra.mxu3 %v1207_v0 }
 0x79b   : > { %v1179_v36 = vsel %vm256_vm0, %v1790_v35, 0.0 }
 0x79c   : > { %1180 = vadd.xlane.f32.xlu1 %v1179_v36  ;;  %1227 = vmatpush.msra.mxu3 %v1206_v43 }
 0x79e   : > { %1228 = vmatpush.msra.mxu3 %v1205_v44 }
 0x80f   : > { %v1181_v37 = vpop.xlane.xlu1 %1180 }
 0x810   : > { %v1182_v38 = vmul.f32 %v1181_v37, %v1679_v8 }
 0x812   : > { %v1183_v39 = vsub.f32 %v1790_v35, %v1182_v38 }
 0x814   : > { %v1184_v40 = vmul.f32 %v1183_v39, %v1183_v39 }
 0x816   : > { %v1185_v41 = vsel %vm256_vm0, %v1184_v40, 0.0 }
 0x817   : > { %1186 = vadd.xlane.f32.xlu2 %v1185_v41 }
 0x88a   : > { %v1187_v45 = vpop.xlane.xlu2 %1186 }
 0x88b   : > { %v1188_v46 = vmul.f32 %v1187_v45, %v1679_v8  ;;  %v1485_v8 = vld [vmem:[%s1914_s5 + $0x3] ss:$0 sm:$0xff] }
 0x88d   : > { %v1189_v47 = vadd.f32 1e-05, %v1188_v46 }
 0x88f   : > { %1508 = vrsqrt.f32 %v1189_v47  ;;  %vm1196_vm11 = vweird.f32 %v1189_v47 }
 0x895   : > { %v1509_v48 = vpop.eup %1508 }
 0x896   : > { %v1191_v49 = vmul.f32 %v1509_v48, %v1189_v47  ;;  %vm1197_vm5 = vweird.f32 %v1509_v48 }
 0x897   : > { %vm1198_vm12 = vmor %vm1196_vm11, %vm1197_vm5 }
 0x898   : > { %v1192_v50 = vmul.f32 %v1509_v48, %v1191_v49 }
 0x89a   : > { %v1193_v51 = vmul.f32 0.5, %v1192_v50 }
 0x89c   : > { %v1194_v52 = vsub.f32 1.5, %v1193_v51 }
 0x89e   : > { %v1195_v53 = vmul.f32 %v1509_v48, %v1194_v52 }
 0x8a0   : > { %v1199_v55 = vsel %vm1198_vm12, %v1509_v48, %v1195_v53 }
 0x8a1   : > { %v1200_v56 = vmul.f32 %v1199_v55, %v1183_v39  ;;  %v1487_v55 = vld [vmem:[%s1914_s5 + $0x5] ss:$0 sm:$0xff] }
 0x8a3   : > { %v1202_v57 = vmul.f32 %v1484_v54, %v1200_v56 }
 0x8a5   : > { %v1204_v58 = vadd.f32 %v1485_v8, %v1202_v57 }
 0x8a7   : > { %1411 = vmatmul.msk.f32.vlgmr.msra.gmra.mxu3 %vm256_vm0, %v1204_v58 }
 0x92a   : > { %v1230_v2 = vpop.f32.mrf.mxu3 }
 0x92b   : > { %v1838_v4 = vadd.f32 %v1486_v62, %v1230_v2 }
 0x92d   : > { %v1234_v6 = vmul.f32 0.70710677, %v1838_v4  ;;  %v1233_v52 = vmul.f32 0.5, %v1838_v4 }
 0x92f   : > { %v1235_v9 = vmul.f32 %v1234_v6, %v1234_v6 }
 0x931   : > { %v1236_v11 = vmin.f32 %v1235_v9, 16.0 }
 0x933   : > { %v1237_v13 = vmul.f32 2.1237322e-06, %v1236_v11  ;;  %v1248_v14 = vmul.f32 3.8918573e-05, %v1236_v11 }
 0x935   : > { %v1238_v16 = vadd.f32 0.00028619796, %v1237_v13  ;;  %v1249_v17 = vadd.f32 0.001143296, %v1248_v14 }
 0x937   : > { %v1239_v19 = vmul.f32 %v1238_v16, %v1236_v11  ;;  %v1250_v20 = vmul.f32 %v1249_v17, %v1236_v11 }
 0x939   : > { %v1251_v22 = vadd.f32 0.014752088, %v1250_v20  ;;  %v1240_v23 = vadd.f32 0.0036580483, %v1239_v19 }
 0x93b   : > { %v1252_v25 = vmul.f32 %v1251_v22, %v1236_v11  ;;  %v1241_v28 = vmul.f32 %v1240_v23, %v1236_v11 }
 0x93d   : > { %v1253_v27 = vadd.f32 0.112945676, %v1252_v25  ;;  %v1242_v32 = vadd.f32 0.05243302, %v1241_v28 }
 0x93f   : > { %v1254_v30 = vmul.f32 %v1253_v27, %v1236_v11  ;;  %v1243_v36 = vmul.f32 %v1242_v32, %v1236_v11 }
 0x941   : > { %v1255_v31 = vadd.f32 0.4994258, %v1254_v30  ;;  %v1244_v37 = vadd.f32 0.18741608, %v1243_v36 }
 0x943   : > { %v1256_v33 = vmul.f32 %v1255_v31, %v1236_v11  ;;  %v1245_v39 = vmul.f32 %v1244_v37, %v1236_v11 }
 0x945   : > { %v1257_v34 = vadd.f32 1.0, %v1256_v33  ;;  %v1246_v0 = vadd.f32 1.1283791, %v1245_v39 }
 0x947   : > { %1510 = vrcp.f32 %v1257_v34  ;;  %v1269_v42 = vand.u32 2147483648, %v1257_v34  ;;  %v1267_v44 = vand.u32 2147483647, %v1257_v34  ;;  %vm1263_vm14 = vweird.f32 %v1257_v34 }
 0x948   : > { %v1247_v47 = vmul.f32 %v1246_v0, %v1234_v6 }
 0x949   : > { %v1270_v46 = vor.u32 1.1754944e-38, %v1269_v42  ;;  %vm1268_vm1 = vcmp.eq.f32.partialorder %v1267_v44, 8.507059e+37 }
 0x94d   : > { %v1511_v38 = vpop.eup %1510 }
 0x94e   : > { %v1259_v40 = vmul.f32 %v1511_v38, %v1257_v34  ;;  %vm1264_vm13 = vweird.f32 %v1511_v38 }
 0x94f   : > { %vm1265_vm15 = vmor %vm1263_vm14, %vm1264_vm13 }
 0x950   : > { %v1260_v41 = vsub.f32 1.0, %v1259_v40 }
 0x952   : > { %v1261_v43 = vmul.f32 %v1511_v38, %v1260_v41 }
 0x954   : > { %v1262_v45 = vadd.f32 %v1511_v38, %v1261_v43 }
 0x956   : > { %v1266_v48 = vsel %vm1265_vm15, %v1511_v38, %v1262_v45 }
 0x957   : > { %v1271_v49 = vsel %vm1268_vm1, %v1270_v46, %v1266_v48 }
 0x958   : > { %v1272_v50 = vmul.f32 %v1271_v49, %v1247_v47 }
 0x95a   : > { %v1412_v51 = vclamps-f32 %v1272_v50, 1.0 }
 0x95c   : > { %v1275_v53 = vadd.f32 1.0, %v1412_v51 }
 0x95e   : > { %v1276_v54 = vmul.f32 %v1275_v53, %v1233_v52 }
 0x960   : > { %1310 = vmatmul.f32.vlgmr.msra.gmra.mxu0 %v1276_v54 }
 0x9dd   : > { %v1311_v56 = vpop.f32.mrf.mxu0 }
 0x9de   : > { %v1312_v8 = vadd.f32 %v1487_v55, %v1311_v56 }
 0x9e0   : > { %v1314_v57 = vadd.f32 %v1312_v8, %v1790_v35 }
 0x9e2   : > { %1315 = vst.msk [vmem:[%s242_s10] sm:$0xff] %vm256_vm0, %v1314_v57 }
 0x9e3   : > { %1539 = shalt.err (!%p1536_p3)
}
 0x9e4   : > { %1417 = dma.vmem_to_hbm [thread:$0]  (%p1660_p5), %s1330_s11, 128, %s1332_s12, %s1317_s25  }
 0x9e5 PF: > { %p1423_p4 = scmp.ge.s32.totalorder %s1574_s24, 2  ;;  %s1343_s17 = sand.u32 1, %s1562_s21  }
 0x9e6   : > { %s1344_s26 = scalar_lea.sflag [#allocation3], %s1343_s17 }
 0x9e7   : > { %p1420_p7 = pnand %p1423_p4, %p1664_p6 }
 0x9e9   : > { %p1421_p8 = pneg %p1420_p7 }
 0x9eb   : > { %1557 = dma.done.wait (%p1421_p8), %s1344_s26, 128  }
 0x9ec   : > { %1559 = vsyncadd (%p1421_p8), %s1344_s26, 4294967168  ;;  %p16_p9 = scmp.ge.s32.totalorder %s1647_s27, 4   ;;  %s1918_s21 = smov %s1566_s22 }
 0x9ed   : > { %s1919_s22 = smov %s1570_s23  ;;  %s1920_s23 = smov %s1658_s30 }
 0x9ee   : > { %s1921_s24 = smov %s1647_s27  ;;  %18 = sbr.rel (!%p16_p9) target bundleno = 3 (0x3), region = 79 }
 0x9f3   :  { %1350 = vsyncpa [#allocation3], 1 }
 0x9f4   :  { %1352 = vsyncpa [#allocation3 + $0x1], 1 }

</bundles_post_ra>
